<compile_context>
chip_gen: v7x
topology: tpu7x:2x2x1
jax: 0.10.0
libtpu: 0.0.40
codegen_flags: <defaults>
</compile_context>

<pallas_src>
import jax
import jax.numpy as jnp
from jax.experimental import pallas as pl
from jax.experimental.pallas import tpu as pltpu
import numpy as np

_LANE = 128
_NEG_LARGE = -1e30  # softplus(_NEG_LARGE) == 0 exactly in f32


# ----------------------------- Pallas kernel --------------------------------
def _attention_kernel(x_ref, w_ref, sh_ref, o_ref):
    # x_ref : (N*Cin , HWp)   whole batch stacked on the sublane axis
    # w_ref : (N*Cout, N*Cin) block-diagonal kron(I_N, bn_scale * W_x)
    # sh_ref: (N*Cout, HWp)   folded shift (conv bias + BN + bias branch); pad lanes = -1e30
    # o_ref : (N*Cout, HWp)
    # 1x1 conv (+ folded BN scale) for the whole batch == one tiny MXU matmul.
    y = jnp.dot(w_ref[...], x_ref[...], preferred_element_type=jnp.float32)
    y = y + sh_ref[...]
    # Softplus, PyTorch default (beta=1, threshold=20).  exp is taken on the
    # clamped value so the discarded branch never produces inf.  Padded lanes
    # (shift = -1e30) map to exactly 0.
    y = jnp.where(y > 20.0, y, jnp.log1p(jnp.exp(jnp.minimum(y, 20.0))))
    # SpaceNormalization: per-(sample, channel) division by the spatial sum.
    # Each row of the fused layout is exactly one (sample, channel) pair.
    denom = jnp.sum(y, axis=1, keepdims=True)              # (N*Cout, 1)
    o_ref[...] = y * pl.reciprocal(denom, approx=False)    # exact


def attention_pallas(x_rows, w_bd, shift_rows):
    """x_rows: (N*Cin, HWp) f32; w_bd: (N*Cout, N*Cin); shift_rows: (N*Cout, HWp)."""
    R, HWp = shift_rows.shape
    K = x_rows.shape[0]
    cost = pl.CostEstimate(
        flops=2 * R * K * HWp + 2 * R * HWp,
        transcendentals=2 * R * HWp,
        bytes_accessed=4 * (K * HWp + R * K + 2 * R * HWp),
    )
    return pl.pallas_call(
        _attention_kernel,
        out_shape=jax.ShapeDtypeStruct((R, HWp), jnp.float32),
        in_specs=[
            pl.BlockSpec(memory_space=pltpu.MemorySpace.VMEM),
            pl.BlockSpec(memory_space=pltpu.MemorySpace.VMEM),
            pl.BlockSpec(memory_space=pltpu.MemorySpace.VMEM),
        ],
        out_specs=pl.BlockSpec(memory_space=pltpu.MemorySpace.VMEM),
        cost_estimate=cost,
    )(x_rows, w_bd, shift_rows)


# ------------------------------ JAX glue -------------------------------------
def bilinear_resize_align_corners(img, out_h, out_w):
    """Matches F.interpolate(mode='bilinear', align_corners=True). img: (1,C,h,w)."""
    _, _, h, w = img.shape
    ys = jnp.linspace(0.0, h - 1.0, out_h) if out_h > 1 else jnp.zeros((out_h,))
    xs = jnp.linspace(0.0, w - 1.0, out_w) if out_w > 1 else jnp.zeros((out_w,))
    y0 = jnp.clip(jnp.floor(ys).astype(jnp.int32), 0, h - 1)
    y1 = jnp.clip(y0 + 1, 0, h - 1)
    x0 = jnp.clip(jnp.floor(xs).astype(jnp.int32), 0, w - 1)
    x1 = jnp.clip(x0 + 1, 0, w - 1)
    wy = (ys - y0.astype(jnp.float32))[None, None, :, None]
    wx = (xs - x0.astype(jnp.float32))[None, None, None, :]
    a = img[:, :, y0][:, :, :, x0]
    b = img[:, :, y0][:, :, :, x1]
    c = img[:, :, y1][:, :, :, x0]
    d = img[:, :, y1][:, :, :, x1]
    top = a * (1.0 - wx) + b * wx
    bot = c * (1.0 - wx) + d * wx
    return top * (1.0 - wy) + bot * wy


def fold_attention_params(params, N, inplanes, H, W):
    """Precompute everything that depends only on (params, N, H, W), not on x.

    Hoisted out of the per-call path: bilinear resize of the bias map, the
    bias-branch matmul, BatchNorm folding, the block-diagonal batch-fused
    weight, and the tiled/padded shift map.
    """
    HW = H * W
    HWp = ((HW + _LANE - 1) // _LANE) * _LANE  # lane-dense guard (pad to x128)

    conv_w = params["conv_w"]                  # (Cout, Cin_total)
    Cout = conv_w.shape[0]

    # Fold BatchNorm (eval mode) into scale/shift.
    # TODO(synk): PyTorch train-mode BN would use batch statistics; eval-mode
    # running stats are used here for a deterministic, stateless kernel.
    eps = 1e-5
    bn_scale = params["gamma"] / jnp.sqrt(params["running_var"] + eps)   # (Cout,)
    bn_shift = params["beta"] - params["running_mean"] * bn_scale        # (Cout,)

    # BN scale folded into the x-part of the 1x1 conv weight.
    w_x = conv_w[:, :inplanes] * bn_scale[:, None]                       # (Cout, Cin)
    # Batch-fused block-diagonal weight: one matmul for the whole batch.
    w_bd = jnp.kron(jnp.eye(N, dtype=jnp.float32), w_x)                  # (N*Cout, N*Cin)

    # conv(concat(x, b)) = W_x @ x + W_b @ b + conv_b ; b is batch-independent,
    # so fold conv bias + BN shift + bias-branch contribution into one map.
    shift = (params["conv_b"] * bn_scale + bn_shift)[:, None]            # (Cout, 1)
    shift = jnp.broadcast_to(shift, (Cout, HW))
    if params.get("bias_param") is not None and conv_w.shape[1] > inplanes:
        ab = bilinear_resize_align_corners(params["bias_param"], H, W)   # (1, Bp, H, W)
        ab_flat = ab[0].reshape(-1, HW)                                  # (Bp, HW)
        w_b = conv_w[:, inplanes:]                                       # (Cout, Bp)
        shift = shift + bn_scale[:, None] * (w_b @ ab_flat)              # (Cout, HW)

    shift_rows = jnp.tile(shift, (N, 1))                                 # (N*Cout, HW)
    if HWp > HW:
        # Padded lanes: huge negative shift -> softplus == 0 -> no effect on sums.
        shift_rows = jnp.pad(shift_rows, ((0, 0), (0, HWp - HW)),
                             constant_values=_NEG_LARGE)

    return {
        "w_bd": w_bd.astype(jnp.float32),
        "shift_rows": shift_rows.astype(jnp.float32),
        "Cout": Cout, "HW": HW, "HWp": HWp,
    }


def attention_forward(x_nchw, folded):
    """Runtime path: one reshape (free), optional pad, one Pallas launch."""
    N, Cin, H, W = x_nchw.shape
    HW, HWp, Cout = folded["HW"], folded["HWp"], folded["Cout"]
    x_rows = x_nchw.reshape(N * Cin, HW).astype(jnp.float32)             # free reshape
    if HWp > HW:
        x_rows = jnp.pad(x_rows, ((0, 0), (0, HWp - HW)))
    out_rows = attention_pallas(x_rows, folded["w_bd"], folded["shift_rows"])
    return out_rows[:, :HW].reshape(N, Cout, H, W)


# ------------------------- pure-JAX reference check --------------------------
def attention_reference(x_nchw, params):
    N, _, H, W = x_nchw.shape
    eps = 1e-5
    ab = bilinear_resize_align_corners(params["bias_param"], H, W)
    ab = jnp.broadcast_to(ab, (N, ab.shape[1], H, W))
    x = jnp.concatenate([x_nchw, ab], axis=1)
    y = jnp.einsum("nihw,oi->nohw", x, params["conv_w"]) + params["conv_b"][None, :, None, None]
    y = (y - params["running_mean"][None, :, None, None]) / jnp.sqrt(
        params["running_var"][None, :, None, None] + eps
    ) * params["gamma"][None, :, None, None] + params["beta"][None, :, None, None]
    y = jnp.where(y > 20.0, y, jnp.log1p(jnp.exp(jnp.minimum(y, 20.0))))
    # TODO(synk): SpaceNormalization is not defined in the provided snippet; it is
    # implemented as x / x.sum(dim=(2,3), keepdim=True) (standard definition;
    # safe here because softplus output is strictly positive).
    return y / jnp.sum(y, axis=(2, 3), keepdims=True)


# --------------------------------- main ---------------------------------------
if __name__ == "__main__":
    # Module config: Attention(inplanes=4, outplanes=4, input_shape=(16,16),
    #                          bias_planes=2, bias_factor=2, space_norm=True, stride=1)
    inplanes, outplanes = 4, 4
    bias_planes, bias_factor = 2, 2
    N, H, W = 2, 16, 16
    total_inplanes = inplanes + bias_planes            # 6
    bias_h, bias_w = H // bias_factor, W // bias_factor

    key = jax.random.PRNGKey(0)
    k1, k2, k3, k4, k5, k6, kx = jax.random.split(key, 7)

    params = {
        # nn.Parameter(torch.ones(1, bias_planes, bias_h, bias_w))
        "bias_param": jnp.ones((1, bias_planes, bias_h, bias_w), jnp.float32),
        # Conv2d(total_inplanes, outplanes, 1): weight (Cout, Cin, 1, 1) -> (Cout, Cin)
        "conv_w": 0.3 * jax.random.normal(k1, (outplanes, total_inplanes), jnp.float32),
        "conv_b": 0.1 * jax.random.normal(k2, (outplanes,), jnp.float32),
        # BatchNorm2d(outplanes) — eval-mode running statistics
        "gamma": 1.0 + 0.1 * jax.random.normal(k3, (outplanes,), jnp.float32),
        "beta": 0.1 * jax.random.normal(k4, (outplanes,), jnp.float32),
        "running_mean": 0.1 * jax.random.normal(k5, (outplanes,), jnp.float32),
        "running_var": 0.5 + jax.random.uniform(k6, (outplanes,), jnp.float32),
    }

    x = jax.random.normal(kx, (N, inplanes, H, W), jnp.float32)

    # One-time precompute (param-only), then the single-launch runtime path.
    folded = jax.tree_util.tree_map(
        lambda a: jax.block_until_ready(a) if isinstance(a, jax.Array) else a,
        fold_attention_params(params, N, inplanes, H, W),
    )

    out = attention_forward(x, folded)
    out = jax.block_until_ready(out)

    ref = attention_reference(x, params)
    np.testing.assert_allclose(np.asarray(out), np.asarray(ref), rtol=1e-5, atol=1e-5)
    assert out.shape == (N, outplanes, H, W)

    print("KERNEL_OK")
</pallas_src>

<mosaic_0001>
module attributes {stable_mosaic.version = 11 : i64} {
  func.func @_attention_kernel(%arg0: memref<8x256xf32, #tpu.memory_space<vmem>>, %arg1: memref<8x8xf32, #tpu.memory_space<vmem>>, %arg2: memref<8x256xf32, #tpu.memory_space<vmem>>, %arg3: memref<8x256xf32, #tpu.memory_space<vmem>>) attributes {dimension_semantics = [], scalar_prefetch = 0 : i64, scratch_operands = 0 : i64, tpu.core_type = #tpu.core_type<tc>} {
    %c0 = arith.constant 0 : index
    %c0_0 = arith.constant 0 : index
    %0 = vector.load %arg1[%c0, %c0_0] : memref<8x8xf32, #tpu.memory_space<vmem>>, vector<8x8xf32>
    %c0_1 = arith.constant 0 : index
    %c0_2 = arith.constant 0 : index
    %1 = vector.load %arg0[%c0_1, %c0_2] : memref<8x256xf32, #tpu.memory_space<vmem>>, vector<8x256xf32>
    %cst = arith.constant dense<0.000000e+00> : vector<8x256xf32>
    %2 = tpu.matmul %0, %1, %cst {dimension_numbers = #tpu.dot_dimension_numbers<[1], [0], [0], [1], [0, 0, 1, 1], [], []>} : vector<8x8xf32>, vector<8x256xf32>, vector<8x256xf32> -> vector<8x256xf32>
    %c0_3 = arith.constant 0 : index
    %c0_4 = arith.constant 0 : index
    %3 = vector.load %arg2[%c0_3, %c0_4] : memref<8x256xf32, #tpu.memory_space<vmem>>, vector<8x256xf32>
    %4 = arith.addf %2, %3 : vector<8x256xf32>
    %cst_5 = arith.constant 2.000000e+01 : f32
    %5 = vector.broadcast %cst_5 : f32 to vector<8x256xf32>
    %6 = arith.cmpf ogt, %4, %5 : vector<8x256xf32>
    %cst_6 = arith.constant 2.000000e+01 : f32
    %7 = vector.broadcast %cst_6 : f32 to vector<8x256xf32>
    %8 = arith.minimumf %4, %7 : vector<8x256xf32>
    %9 = math.exp %8 : vector<8x256xf32>
    %10 = math.log1p %9 : vector<8x256xf32>
    %11 = arith.select %6, %4, %10 : vector<8x256xi1>, vector<8x256xf32>
    %cst_7 = arith.constant dense<0.000000e+00> : vector<8xf32>
    %12 = vector.multi_reduction <add>, %11, %cst_7 [1] : vector<8x256xf32> to vector<8xf32>
    %13 = vector.shape_cast %12 : vector<8xf32> to vector<8x1xf32>
    %14 = tpu.reciprocal %13 : vector<8x1xf32> -> vector<8x1xf32>
    %15 = vector.broadcast %14 : vector<8x1xf32> to vector<8x256xf32>
    %16 = arith.mulf %11, %15 : vector<8x256xf32>
    %c0_8 = arith.constant 0 : index
    %c0_9 = arith.constant 0 : index
    %17 = vector.load %arg3[%c0_8, %c0_9] : memref<8x256xf32, #tpu.memory_space<vmem>>, vector<8x256xf32>
    tpu.vector_store %arg3[%c0_8, %c0_9], %16 {strides = array<i32>} : memref<8x256xf32, #tpu.memory_space<vmem>>, vector<8x256xf32>,
    return
  }
}

</mosaic_0001>

<bundles_post_ra>
// kernel: tpu_custom_call.1
= control target key start
LH: loop header
LB: loop body
LE: loop exit
PB: predicated region body
PF: predicated region fallthrough
CT: control target
= control target key end

     0   :  { %8 = vsyncpa [#allocation3], 0  ;;  %s365_s0 = inlined_call_operand.hbm [shape: f32[8,256], index: 0, kind: input, shape index: {}]   ;;  %s366_s1 = inlined_call_operand.hbm [shape: f32[8,8], index: 1, kind: input, shape index: {}]   ;;  %s367_s2 = inlined_call_operand.hbm [shape: f32[8,256], index: 2, kind: input, shape index: {}]   ;;  %s368_s3 = inlined_call_operand.hbm [shape: f32[8,256], index: 3, kind: output, shape index: {}]  }
   0x1   :  { %9 = vsyncpa [#allocation6], 0 }
   0x2   :  { %10 = vsyncpa [#allocation4], 0  ;;  %s292_s12 = smov [#allocation5]   ;;  %s293_s14 = smov [#allocation2]  }
   0x3   :  { %s27_s13 = sshll.u32 %s292_s12, 4  ;;  %s17_s15 = sshll.u32 %s293_s14, 4  ;;  %s28_s13 = int_to_ptr.vmem [resolvable:$true] %s27_s13  ;;  %s18_s15 = int_to_ptr.vmem [resolvable:$true] %s17_s15 }
   0x4   :  { %s198_s18 = scalar_lea.hbm %s366_s1, 128 }
   0x5   :  { %p199_p0 = scmp.ne.s32.totalorder %s366_s1, %s198_s18  ;;  %p202_p1 = scmp.lt.u32.totalorder %s198_s18, %s366_s1 }
   0x7   :  { %p204_p2 = pnand %p202_p1, %p199_p0 }
   0x9   :  { %207 = shalt.err (!%p204_p2)
}
   0xa   :  { %s208_s23 = scalar_lea.vmem %s28_s13, 128  ;;  %p213_p4 = scmp.lt.s32.totalorder %s28_s13, %s28_s13 }
   0xb   :  { %p209_p3 = scmp.ne.s32.totalorder %s28_s13, %s208_s23  ;;  %p214_p5 = scmp.lt.s32.totalorder %s208_s23, %s208_s23 }
   0xd   :  { %p215_p6 = por %p214_p5, %p213_p4 }
   0xf   :  { %p216_p7 = pnand %p215_p6, %p209_p3 }
  0x11   :  { %219 = shalt.err (!%p216_p7)
}
  0x12   :  { %30 = dma.hbm_to_vmem [thread:$0]  %s366_s1, 128, %s28_s13, [#allocation6]  }
  0x13   :  { %s220_s28 = scalar_lea.hbm %s365_s0, 256 }
  0x14   :  { %p221_p8 = scmp.ne.s32.totalorder %s365_s0, %s220_s28  ;;  %p224_p9 = scmp.lt.u32.totalorder %s220_s28, %s365_s0 }
  0x16   :  { %p226_p10 = pnand %p224_p9, %p221_p8 }
  0x18   :  { %229 = shalt.err (!%p226_p10)
}
  0x19   :  { %s230_s6 = scalar_lea.vmem %s18_s15, 256  ;;  %p235_p12 = scmp.lt.s32.totalorder %s18_s15, %s18_s15 }
  0x1a   :  { %p231_p11 = scmp.ne.s32.totalorder %s18_s15, %s230_s6  ;;  %p236_p13 = scmp.lt.s32.totalorder %s230_s6, %s230_s6 }
  0x1c   :  { %p237_p0 = por %p236_p13, %p235_p12 }
  0x1e   :  { %p238_p1 = pnand %p237_p0, %p231_p11 }
  0x20   :  { %241 = shalt.err (!%p238_p1)
}
  0x21   :  { %20 = dma.hbm_to_vmem [thread:$0]  %s365_s0, 256, %s18_s15, [#allocation3]  }
  0x22   :  { %s294_s8 = smov [#allocation7]   ;;  %s242_s12 = scalar_lea.hbm %s367_s2, 256 }
  0x23   :  { %s37_s9 = sshll.u32 %s294_s8, 4  ;;  %p243_p2 = scmp.ne.s32.totalorder %s367_s2, %s242_s12  ;;  %s38_s9 = int_to_ptr.vmem [resolvable:$true] %s37_s9 }
  0x24   :  { %p246_p3 = scmp.lt.u32.totalorder %s242_s12, %s367_s2 }
  0x26   :  { %p248_p4 = pnand %p246_p3, %p243_p2 }
  0x28   :  { %251 = shalt.err (!%p248_p4)
}
  0x29   :  { %s252_s18 = scalar_lea.vmem %s38_s9, 256  ;;  %p257_p6 = scmp.lt.s32.totalorder %s38_s9, %s38_s9 }
  0x2a   :  { %p253_p5 = scmp.ne.s32.totalorder %s38_s9, %s252_s18  ;;  %p258_p7 = scmp.lt.s32.totalorder %s252_s18, %s252_s18 }
  0x2c   :  { %p259_p8 = por %p258_p7, %p257_p6 }
  0x2e   :  { %p260_p9 = pnand %p259_p8, %p253_p5 }
  0x30   :  { %263 = shalt.err (!%p260_p9)
}
  0x31   :  { %40 = dma.hbm_to_vmem [thread:$0]  %s367_s2, 256, %s38_s9, [#allocation6]  }
  0x32   :  { %286 = dma.done.wait [#allocation3], 256  }
  0x33   :  { %287 = vsyncadd [#allocation3], 4294967040 }
  0x34   :  { %288 = dma.done.wait [#allocation6], 384  }
  0x35   :  { %289 = vsyncadd [#allocation6], 4294966912  ;;  %v295_v0 = vmov 0.0   ;;  %v52_v1 = vld [vmem:[#allocation2 + $0x8] sm:$0xff]  ;;  %v51_v2 = vld [vmem:[#allocation2] sm:$0xff]  ;;  %vm55_vm0 = vcmask 64512  }
  0x36   :  { %123 = vmatprep.mubr.f32.mxu0 %v295_v0  ;;  %v50_v3 = vld [vmem:[#allocation5] sm:$0xff]  ;;  %59 = vmatprep.subr.mxu0 %v52_v1  ;;  %v53_v4 = vld [vmem:[#allocation7] sm:$0xff]  ;;  %v54_v5 = vld [vmem:[#allocation7 + $0x8] sm:$0xff]  ;;  %s296_s2 = smov [#allocation8]  }
  0x37   :  { %60 = vmatpush1.msra.mxu0 %v51_v2  ;;  %s172_s19 = sshll.u32 %s296_s2, 4  ;;  %s173_s19 = int_to_ptr.vmem [resolvable:$true] %s172_s19 }
  0x38   :  { %182 = vmatmul.mubr.msk.f32.vlgmr.msra.gmra.mrb[0].mxu0 %vm55_vm0, %v50_v3  ;;  %s264_s20 = scalar_lea.vmem %s173_s19, 256  ;;  %p269_p11 = scmp.lt.s32.totalorder %s173_s19, %s173_s19 }
  0x39   :  { %p265_p10 = scmp.ne.s32.totalorder %s173_s19, %s264_s20  ;;  %p270_p12 = scmp.lt.s32.totalorder %s264_s20, %s264_s20 }
  0x3b   :  { %p271_p13 = por %p270_p12, %p269_p11 }
  0x3d   :  { %p272_p0 = pnand %p271_p13, %p265_p10 }
 0x10b   :  { %v125_v6 = vpop.f32.mrb[0].mxu0 }
 0x10c   :  { %v126_v7 = vadd.f32 %v125_v6, %v53_v4  ;;  %v127_v8 = vpop.f32.mrb[1].mxu0 }
 0x10d   :  { %v128_v9 = vadd.f32 %v127_v8, %v54_v5 }
 0x10e   :  { %v132_v10 = vmin.f32 %v126_v7, 20.0  ;;  %vm130_vm2 = vcmp.gt.f32.partialorder %v126_v7, 20.0 }
 0x10f   :  { %v133_v11 = vmin.f32 %v128_v9, 20.0  ;;  %vm131_vm4 = vcmp.gt.f32.partialorder %v128_v9, 20.0 }
 0x110   :  { %v134_v12 = vmul.f32 1.442695, %v132_v10 }
 0x111   :  { %v136_v13 = vmul.f32 1.442695, %v133_v11 }
 0x112   :  { %188 = vpow2.f32 %v134_v12 }
 0x113   :  { %190 = vpow2.f32 %v136_v13 }
 0x11c   :  { %v189_v14 = vpop.eup %188 }
 0x11d   :  { %v191_v15 = vpop.eup %190  ;;  %v138_v16 = vadd.f32 1.0, %v189_v14  ;;  %v141_v18 = vmul.f32 -0.5, %v189_v14  ;;  %v144_v21 = vand.u32 2147483647, %v189_v14 }
 0x11e   :  { %v147_v17 = vadd.f32 1.0, %v191_v15  ;;  %v150_v19 = vmul.f32 -0.5, %v191_v15  ;;  %v153_v23 = vand.u32 2147483647, %v191_v15 }
 0x11f   :  { %192 = vlog2.f32 %v138_v16  ;;  %v142_v20 = vadd.f32 1.0, %v141_v18  ;;  %vm145_vm1 = vcmp.lt.f32.partialorder %v144_v21, 0.0004427343 }
 0x120   :  { %194 = vlog2.f32 %v147_v17  ;;  %v151_v22 = vadd.f32 1.0, %v150_v19  ;;  %vm154_vm3 = vcmp.lt.f32.partialorder %v153_v23, 0.0004427343 }
 0x121   :  { %v143_v27 = vmul.f32 %v189_v14, %v142_v20 }
 0x122   :  { %v152_v29 = vmul.f32 %v191_v15, %v151_v22 }
 0x129   :  { %v193_v24 = vpop.eup %192 }
 0x12a   :  { %v195_v25 = vpop.eup %194  ;;  %v140_v26 = vmul.f32 0.6931472, %v193_v24 }
 0x12b   :  { %v149_v28 = vmul.f32 0.6931472, %v195_v25 }
 0x12c   :  { %v146_v30 = vsel %vm145_vm1, %v143_v27, %v140_v26 }
 0x12d   :  { %v155_v31 = vsel %vm154_vm3, %v152_v29, %v149_v28  ;;  %v156_v32 = vsel %vm130_vm2, %v126_v7, %v146_v30 }
 0x12e   :  { %v157_v33 = vsel %vm131_vm4, %v128_v9, %v155_v31 }
 0x12f   :  { %v158_v34 = vadd.f32 %v157_v33, %v156_v32 }
 0x131   :  { %159 = vadd.xlane.f32.xlu0 %v158_v34 }
 0x1be   :  { %v160_v35 = vpop.xlane.xlu0 %159 }
 0x1bf   :  { %196 = vrcp.f32 %v160_v35 }
 0x1c9   :  { %v197_v36 = vpop.eup %196 }
 0x1ca   :  { %v162_v37 = vmul.f32 %v197_v36, %v156_v32  ;;  %v163_v38 = vmul.f32 %v197_v36, %v157_v33 }
 0x1cc   :  { %164 = vst [vmem:[#allocation8] sm:$0xff] %v162_v37  ;;  %165 = vst [vmem:[#allocation8 + $0x8] sm:$0xff] %v163_v38 }
 0x1cd   :  { %275 = shalt.err (!%p272_p0)
}
 0x1ce   :  { %s276_s23 = scalar_lea.hbm %s368_s3, 256 }
 0x1cf   :  { %p277_p1 = scmp.ne.s32.totalorder %s368_s3, %s276_s23  ;;  %p280_p2 = scmp.lt.u32.totalorder %s276_s23, %s368_s3 }
 0x1d1   :  { %p282_p3 = pnand %p280_p2, %p277_p1 }
 0x1d3   :  { %285 = shalt.err (!%p282_p3)
}
 0x1d4   :  { %175 = dma.vmem_to_hbm [thread:$0]  %s173_s19, 256, %s368_s3, [#allocation4]  }
 0x1d5   :  { %290 = dma.done.wait [#allocation4], 256  }
 0x1d6   :  { %291 = vsyncadd [#allocation4], 4294967040 }
 0x1d7   :  { %179 = vsyncpa [#allocation3], 1 }
 0x1d8   :  { %180 = vsyncpa [#allocation6], 1 }
 0x1d9   :  { %181 = vsyncpa [#allocation4], 1 }

</bundles_post_ra>
